<compile_context>
chip_gen: v7x
topology: tpu7x:2x2x1
jax: 0.10.0
libtpu: 0.0.40
codegen_flags: <defaults>
</compile_context>

<pallas_src>
import jax
import jax.numpy as jnp
from jax import lax
from jax.experimental import pallas as pl
from jax.experimental.pallas import tpu as pltpu

IN_FEATURES = 20
OUT_FEATURES = 20
BATCH = 2

# Row offsets inside the packed parameter buffer (8-sublane aligned starts).
_WF_OFF = 0                 # rows  0..19 : Wf = W.T @ rand_weight   (folded matmul 1)
_WT_OFF = 24                # rows 24..43 : W.T                       (second linear)
_BF_OFF = 48                # row  48     : bf = b @ rand_weight + 1
_B_OFF = 56                 # row  56     : b
_PACK_ROWS = 64             # padded to a multiple of 8 sublanes


def pack_params(w, b, rand_weight):
    """Pack (and pre-fold) all parameters into one buffer. Done once, outside the kernel call.

    w           : (out, in)  torch nn.Linear weight layout
    b           : (out,)
    rand_weight : (in, out)  fixed, non-trainable
    """
    w = w.astype(jnp.float32)
    b = b.astype(jnp.float32)
    rw = rand_weight.astype(jnp.float32)

    wt = w.T                     # (in, out): x @ W.T == x @ wt  (transpose done at pack time)
    wf = wt @ rw                 # fold linear1 + rand_weight:  (x @ W.T) @ rw == x @ (W.T @ rw)
    bf = b @ rw + 1.0            # fold bias + "+1" of the relu branch

    p = jnp.zeros((_PACK_ROWS, IN_FEATURES), dtype=jnp.float32)
    p = p.at[_WF_OFF:_WF_OFF + IN_FEATURES, :].set(wf)
    p = p.at[_WT_OFF:_WT_OFF + IN_FEATURES, :].set(wt)
    p = p.at[_BF_OFF, :].set(bf)
    p = p.at[_B_OFF, :].set(b)
    return p


def fixed_hidden_mlp_kernel(x_ref, p_ref, out_ref):
    """Whole forward pass in one kernel invocation (tiny shapes, no grid).

    x_ref  : (B, 20)   VMEM   input
    p_ref  : (64, 20)  VMEM   packed params: Wf | W.T | bf | b
    out_ref: (1, 1)    SMEM   scalar result
    """
    x = x_ref[...]
    wf = p_ref[_WF_OFF:_WF_OFF + IN_FEATURES, :]     # (20, 20)  W.T @ rand_weight
    wt = p_ref[_WT_OFF:_WT_OFF + IN_FEATURES, :]     # (20, 20)  W.T
    bf = p_ref[_BF_OFF:_BF_OFF + 1, :]               # (1, 20)   b @ rand_weight + 1
    b = p_ref[_B_OFF:_B_OFF + 1, :]                  # (1, 20)   bias row

    # relu(linear(x) @ rand_weight + 1)  ==  relu(x @ Wf + bf)
    h = jnp.maximum(
        jnp.dot(x, wf, preferred_element_type=jnp.float32) + bf, 0.0)
    # linear(h)  ==  h @ W.T + b
    h = jnp.dot(h, wt, preferred_element_type=jnp.float32) + b

    # Both reductions over h, kept as (1,1) vectors for the bit-pattern math.
    s_abs = jnp.sum(jnp.sum(jnp.abs(h), axis=1, keepdims=True),
                    axis=0, keepdims=True)           # (1, 1)
    s_sum = jnp.sum(jnp.sum(h, axis=1, keepdims=True),
                    axis=0, keepdims=True)           # (1, 1)

    # while X.abs().sum() > 1: X /= 2
    # Halving is exact in fp32, so the loop equals one multiply by 2^-n, where
    # n is its trip count, derived straight-line from the exponent/mantissa
    # bits of s_abs (no serial data-dependent loop):
    #   n = 0          if s_abs <= 1
    #   n = e          if s_abs == 2^e            (mantissa == 0)
    #   n = e + 1      if 2^e < s_abs < 2^(e+1)
    bits = pltpu.bitcast(s_abs, jnp.int32)           # s_abs >= 0 -> sign bit 0
    exp_unbiased = ((bits >> 23) & 0xFF) - 127
    mant = bits & 0x7FFFFF
    n = jnp.where(s_abs > 1.0,
                  exp_unbiased + jnp.where(mant != 0, 1, 0),
                  0)
    # scale = 2^-n, built bit-exactly.  Valid (identical to repeated exact
    # halving) for |sum| < 2^126, i.e. everywhere the non-subnormal assumption
    # of the shortcut holds anyway.
    n = jnp.clip(n, 0, 126)
    scale = pltpu.bitcast((127 - n) << 23, jnp.float32)

    # return X.sum()  ==  sum(h) * 2^-n   (power-of-two scaling commutes
    # exactly with the summation in the normal fp32 range).
    # Full-reduce the (1,1) product to a scalar for the SMEM store.
    out_ref[0, 0] = jnp.sum(s_sum * scale)


@jax.jit
def fixed_hidden_mlp(x, packed_params):
    out = pl.pallas_call(
        fixed_hidden_mlp_kernel,
        out_shape=jax.ShapeDtypeStruct((1, 1), jnp.float32),
        in_specs=[
            pl.BlockSpec(memory_space=pltpu.MemorySpace.VMEM),  # x
            pl.BlockSpec(memory_space=pltpu.MemorySpace.VMEM),  # packed params
        ],
        out_specs=pl.BlockSpec(memory_space=pltpu.MemorySpace.SMEM),  # scalar
        cost_estimate=pl.CostEstimate(
            flops=2 * 2 * BATCH * IN_FEATURES * OUT_FEATURES,   # 2 tiny matmuls
            transcendentals=0,
            bytes_accessed=(BATCH * IN_FEATURES
                            + _PACK_ROWS * IN_FEATURES + 1) * 4,
        ),
    )(x, packed_params)
    return out[0, 0]


def reference(x, w, b, rand_weight):
    """Pure-JAX reference (literal, un-folded module semantics)."""
    h = x @ w.T + b
    h = jnp.maximum(h @ rand_weight + 1.0, 0.0)
    h = h @ w.T + b

    def cond(h):
        return jnp.sum(jnp.abs(h)) > 1.0

    def body(h):
        return h / 2.0

    h = lax.while_loop(cond, body, h)
    return jnp.sum(h)


if __name__ == "__main__":
    key = jax.random.PRNGKey(0)
    kx, kw, kb, kr = jax.random.split(key, 4)

    # Deterministic synthetic parameters, matching torch init distributions:
    #   rand_weight ~ U[0,1) (torch.rand); Linear(20,20) ~ U(-1/sqrt(20), 1/sqrt(20))
    x = jax.random.uniform(kx, (BATCH, IN_FEATURES), dtype=jnp.float32)
    bound = 1.0 / float(IN_FEATURES) ** 0.5
    w = jax.random.uniform(kw, (OUT_FEATURES, IN_FEATURES), dtype=jnp.float32,
                           minval=-bound, maxval=bound)
    b = jax.random.uniform(kb, (OUT_FEATURES,), dtype=jnp.float32,
                           minval=-bound, maxval=bound)
    rand_weight = jax.random.uniform(kr, (IN_FEATURES, OUT_FEATURES),
                                     dtype=jnp.float32)

    packed = pack_params(w, b, rand_weight)   # built once, outside the hot path

    result = jax.block_until_ready(fixed_hidden_mlp(x, packed))
    ref = jax.block_until_ready(reference(x, w, b, rand_weight))
    assert jnp.allclose(result, ref, rtol=1e-5, atol=1e-5), (result, ref)

    print("KERNEL_OK")
</pallas_src>

<mosaic_0001>
module attributes {stable_mosaic.version = 11 : i64} {
  func.func @fixed_hidden_mlp_kernel(%arg0: memref<2x20xf32, #tpu.memory_space<vmem>>, %arg1: memref<64x20xf32, #tpu.memory_space<vmem>>, %arg2: memref<1x1xf32, #tpu.memory_space<smem>>) attributes {dimension_semantics = [], scalar_prefetch = 0 : i64, scratch_operands = 0 : i64, tpu.core_type = #tpu.core_type<tc>} {
    %c0 = arith.constant 0 : index
    %c0_0 = arith.constant 0 : index
    %0 = vector.load %arg0[%c0, %c0_0] : memref<2x20xf32, #tpu.memory_space<vmem>>, vector<2x20xf32>
    %c0_1 = arith.constant 0 : index
    %c0_2 = arith.constant 0 : index
    %1 = vector.load %arg1[%c0_1, %c0_2] : memref<64x20xf32, #tpu.memory_space<vmem>>, vector<20x20xf32>
    %c24 = arith.constant 24 : index
    %c0_3 = arith.constant 0 : index
    %2 = vector.load %arg1[%c24, %c0_3] : memref<64x20xf32, #tpu.memory_space<vmem>>, vector<20x20xf32>
    %c48 = arith.constant 48 : index
    %c0_4 = arith.constant 0 : index
    %3 = vector.load %arg1[%c48, %c0_4] : memref<64x20xf32, #tpu.memory_space<vmem>>, vector<1x20xf32>
    %c56 = arith.constant 56 : index
    %c0_5 = arith.constant 0 : index
    %4 = vector.load %arg1[%c56, %c0_5] : memref<64x20xf32, #tpu.memory_space<vmem>>, vector<1x20xf32>
    %cst = arith.constant dense<0.000000e+00> : vector<2x20xf32>
    %5 = tpu.matmul %0, %1, %cst {dimension_numbers = #tpu.dot_dimension_numbers<[1], [0], [0], [1], [0, 0, 1, 1], [], []>} : vector<2x20xf32>, vector<20x20xf32>, vector<2x20xf32> -> vector<2x20xf32>
    %6 = vector.broadcast %3 : vector<1x20xf32> to vector<2x20xf32>
    %7 = arith.addf %5, %6 : vector<2x20xf32>
    %cst_6 = arith.constant 0.000000e+00 : f32
    %8 = vector.broadcast %cst_6 : f32 to vector<2x20xf32>
    %9 = arith.maximumf %7, %8 : vector<2x20xf32>
    %cst_7 = arith.constant dense<0.000000e+00> : vector<2x20xf32>
    %10 = tpu.matmul %9, %2, %cst_7 {dimension_numbers = #tpu.dot_dimension_numbers<[1], [0], [0], [1], [0, 0, 1, 1], [], []>} : vector<2x20xf32>, vector<20x20xf32>, vector<2x20xf32> -> vector<2x20xf32>
    %11 = vector.broadcast %4 : vector<1x20xf32> to vector<2x20xf32>
    %12 = arith.addf %10, %11 : vector<2x20xf32>
    %13 = math.absf %12 : vector<2x20xf32>
    %cst_8 = arith.constant dense<0.000000e+00> : vector<2xf32>
    %14 = vector.multi_reduction <add>, %13, %cst_8 [1] : vector<2x20xf32> to vector<2xf32>
    %15 = vector.shape_cast %14 : vector<2xf32> to vector<2x1xf32>
    %cst_9 = arith.constant dense<0.000000e+00> : vector<1xf32>
    %16 = vector.multi_reduction <add>, %15, %cst_9 [0] : vector<2x1xf32> to vector<1xf32>
    %17 = vector.shape_cast %16 : vector<1xf32> to vector<1x1xf32>
    %cst_10 = arith.constant dense<0.000000e+00> : vector<2xf32>
    %18 = vector.multi_reduction <add>, %12, %cst_10 [1] : vector<2x20xf32> to vector<2xf32>
    %19 = vector.shape_cast %18 : vector<2xf32> to vector<2x1xf32>
    %cst_11 = arith.constant dense<0.000000e+00> : vector<1xf32>
    %20 = vector.multi_reduction <add>, %19, %cst_11 [0] : vector<2x1xf32> to vector<1xf32>
    %21 = vector.shape_cast %20 : vector<1xf32> to vector<1x1xf32>
    %22 = tpu.bitcast %17 : vector<1x1xf32> -> vector<1x1xi32>
    %c23_i32 = arith.constant 23 : i32
    %23 = vector.broadcast %c23_i32 : i32 to vector<1x1xi32>
    %24 = arith.shrsi %22, %23 : vector<1x1xi32>
    %c255_i32 = arith.constant 255 : i32
    %25 = vector.broadcast %c255_i32 : i32 to vector<1x1xi32>
    %26 = arith.andi %24, %25 : vector<1x1xi32>
    %c127_i32 = arith.constant 127 : i32
    %27 = vector.broadcast %c127_i32 : i32 to vector<1x1xi32>
    %28 = arith.subi %26, %27 : vector<1x1xi32>
    %c8388607_i32 = arith.constant 8388607 : i32
    %29 = vector.broadcast %c8388607_i32 : i32 to vector<1x1xi32>
    %30 = arith.andi %22, %29 : vector<1x1xi32>
    %cst_12 = arith.constant 1.000000e+00 : f32
    %31 = vector.broadcast %cst_12 : f32 to vector<1x1xf32>
    %32 = arith.cmpf ogt, %17, %31 : vector<1x1xf32>
    %c0_i32 = arith.constant 0 : i32
    %33 = vector.broadcast %c0_i32 : i32 to vector<1x1xi32>
    %34 = arith.cmpi ne, %30, %33 : vector<1x1xi32>
    %c1_i32 = arith.constant 1 : i32
    %c0_i32_13 = arith.constant 0 : i32
    %35 = vector.broadcast %c1_i32 : i32 to vector<1x1xi32>
    %36 = vector.broadcast %c0_i32_13 : i32 to vector<1x1xi32>
    %37 = arith.select %34, %35, %36 : vector<1x1xi1>, vector<1x1xi32>
    %38 = arith.addi %28, %37 : vector<1x1xi32>
    %c0_i32_14 = arith.constant 0 : i32
    %39 = vector.broadcast %c0_i32_14 : i32 to vector<1x1xi32>
    %40 = arith.select %32, %38, %39 : vector<1x1xi1>, vector<1x1xi32>
    %c0_i32_15 = arith.constant 0 : i32
    %c126_i32 = arith.constant 126 : i32
    %41 = vector.broadcast %c0_i32_15 : i32 to vector<1x1xi32>
    %42 = arith.maxsi %41, %40 : vector<1x1xi32>
    %43 = vector.broadcast %c126_i32 : i32 to vector<1x1xi32>
    %44 = arith.minsi %43, %42 : vector<1x1xi32>
    %c127_i32_16 = arith.constant 127 : i32
    %45 = vector.broadcast %c127_i32_16 : i32 to vector<1x1xi32>
    %46 = arith.subi %45, %44 : vector<1x1xi32>
    %c23_i32_17 = arith.constant 23 : i32
    %47 = vector.broadcast %c23_i32_17 : i32 to vector<1x1xi32>
    %48 = arith.shli %46, %47 : vector<1x1xi32>
    %49 = tpu.bitcast %48 : vector<1x1xi32> -> vector<1x1xf32>
    %50 = arith.mulf %21, %49 : vector<1x1xf32>
    %51 = vector.shape_cast %50 : vector<1x1xf32> to vector<1x1x1xf32>
    %cst_18 = arith.constant dense<0.000000e+00> : vector<1xf32>
    %52 = vector.multi_reduction <add>, %51, %cst_18 [1, 2] : vector<1x1x1xf32> to vector<1xf32>
    %53 = vector.shape_cast %52 : vector<1xf32> to vector<1x1x1xf32>
    %54 = vector.extract %53[0, 0, 0] : f32 from vector<1x1x1xf32>
    %c0_19 = arith.constant 0 : index
    %c0_20 = arith.constant 0 : index
    %55 = memref.load %arg2[%c0_19, %c0_20] : memref<1x1xf32, #tpu.memory_space<smem>>
    memref.store %54, %arg2[%c0_19, %c0_20] : memref<1x1xf32, #tpu.memory_space<smem>>
    return
  }
}

</mosaic_0001>

<bundles_post_ra>
// kernel: fixed_hidden_mlp.1
= control target key start
LH: loop header
LB: loop body
LE: loop exit
PB: predicated region body
PF: predicated region fallthrough
CT: control target
= control target key end

     0   :  { %v300_v2 = vmov 0.0|0.0   ;;  %vm301_vm0 = vmmov 0   ;;  %v302_v4 = vmov 0.0   ;;  %s359_s0 = inlined_call_operand.vmem [shape: f32[2,20], index: 0, kind: input, shape index: {}]   ;;  %s360_s1 = inlined_call_operand.vmem [shape: f32[64,20], index: 1, kind: input, shape index: {}]   ;;  %s361_s2 = inlined_call_operand.hbm [shape: f32[1,1], index: 2, kind: output, shape index: {}]  }
   0x1   :  { %v13_v0 = vld [vmem:[%s360_s1] sm:$0xff]  ;;  %v14_v1 = vld [vmem:[%s360_s1 + $0x8] sm:$0xff]  ;;  %275 = vmatprep.subr.bf16.mxu0 %v300_v2  ;;  %278 = vmatprep.subr.bf16.mxu1 %v300_v2 }
   0x2   :  { %v276_v3 = vpack.c.bf16 %v14_v1, %v13_v0  ;;  %263 = vmatprep.mubr.msk.f32.mxu0 %vm301_vm0, %v302_v4  ;;  %272 = vmatprep.mubr.msk.f32.mxu1 %vm301_vm0, %v302_v4 }
   0x3   :  { %7 = vsyncpa [#allocation3], 0  ;;  %v15_v5 = vld [vmem:[%s360_s1 + $0x10] sm:$0xf]  ;;  %vm29_vm1 = vcmask 1043456   ;;  %vm25_vm2 = vcmask 162816  }
   0x4   :  { %277 = vmatpush3.bf16.msra.mxu0 %v276_v3  ;;  %v12_v6 = vld [vmem:[%s359_s0] sm:$0x3]  ;;  %v16_v7 = vld [vmem:[%s360_s1 + $0x18] sm:$0xff]  ;;  %v18_v10 = vld [vmem:[%s360_s1 + $0x28] sm:$0xf]  ;;  %vm185_vm3 = vcmask 156672  }
   0x5   :  { %261 = vmatprep.subr.mxu0 %v302_v4  ;;  %v17_v8 = vld [vmem:[%s360_s1 + $0x20] sm:$0xff]  ;;  %v242_v11 = vld [vmem:[%s360_s1 + $0x30] ss:$0 sm:$0xff]  ;;  %v245_v16 = vld [vmem:[%s360_s1 + $0x38] ss:$0 sm:$0xff]  ;;  %vm189_vm4 = vcmask 1041408  }
   0x6   :  { %v279_v9 = vpack.c.bf16 %v17_v8, %v16_v7  ;;  %v303_v40 = vmov 0   ;;  %s288_s28 = scalar_lea.hbm %s361_s2, 16 }
   0x7   :  { %p289_p0 = scmp.ne.s32.totalorder %s361_s2, %s288_s28  ;;  %p292_p1 = scmp.lt.u32.totalorder %s288_s28, %s361_s2 }
   0x8   :  { %262 = vmatpush3.msk.msra.mxu0 %vm29_vm1, %v15_v5  ;;  %280 = vmatpush3.bf16.msra.mxu1 %v279_v9 }
   0x9   :  { %264 = vmatmul.mubr.msk.f32.vlgmr.msra.gmra.mrb[0].mxu0 %vm25_vm2, %v12_v6  ;;  %270 = vmatprep.subr.mxu1 %v302_v4  ;;  %p294_p2 = pnand %p292_p1, %p289_p0 }
   0xc   :  { %271 = vmatpush3.msk.msra.mxu1 %vm29_vm1, %v18_v10 }
  0xdc   :  { %v99_v12 = vpop.f32.mrb[0].mxu0 }
  0xdd   :  { %v100_v13 = vadd.f32 %v242_v11, %v99_v12  ;;  %v265_v14 = vpop.f32.mrb[1].mxu0 }
  0xdf   :  { %v103_v15 = vmax.f32 %v100_v13, 0.0 }
  0xe1   :  { %273 = vmatmul.mubr.msk.f32.vlgmr.msra.gmra.mrb[0].mxu1 %vm25_vm2, %v103_v15 }
 0x1b4   :  { %v180_v17 = vpop.f32.mrb[0].mxu1 }
 0x1b5   :  { %v181_v18 = vadd.f32 %v245_v16, %v180_v17  ;;  %v274_v19 = vpop.f32.mrb[1].mxu1 }
 0x1b7   :  { %v184_v20 = vand.u32 2147483647, %v181_v18  ;;  %v197_v22 = vsel %vm185_vm3, %v181_v18, 0.0 }
 0x1b9   :  { %v186_v21 = vsel %vm185_vm3, %v184_v20, 0.0 }
 0x1ba   :  { %187 = vadd.xlane.f32.xlu0 %v186_v21 }
 0x1be   :  { %198 = vadd.xlane.f32.xlu0 %v197_v22 }
 0x247   :  { %v188_v23 = vpop.xlane.xlu0 %187 }
 0x248   :  { %v190_v24 = vsel %vm189_vm4, %v188_v23, 0.0 }
 0x249   :  { %v191_v25 = vrot.slane %v190_v24, 4 }
 0x24b   :  { %v192_v26 = vadd.f32 %v191_v25, %v190_v24  ;;  %v199_v27 = vpop.xlane.xlu0 %198 }
 0x24c   :  { %v200_v29 = vsel %vm189_vm4, %v199_v27, 0.0 }
 0x24d   :  { %v193_v28 = vrot.slane %v192_v26, 2  ;;  %v201_v31 = vrot.slane %v200_v29, 4 }
 0x24f   :  { %v194_v30 = vadd.f32 %v193_v28, %v192_v26  ;;  %v202_v34 = vadd.f32 %v201_v31, %v200_v29 }
 0x251   :  { %v195_v32 = vrot.slane %v194_v30, 1  ;;  %v203_v38 = vrot.slane %v202_v34, 2 }
 0x253   :  { %v196_v33 = vadd.f32 %v195_v32, %v194_v30  ;;  %v204_v43 = vadd.f32 %v203_v38, %v202_v34 }
 0x255   :  { %v208_v35 = vshra.s32 %v196_v33, 23  ;;  %v211_v36 = vand.u32 8388607, %v196_v33  ;;  %vm212_vm6 = vcmp.gt.f32.partialorder %v196_v33, 1.0  ;;  %v205_v46 = vrot.slane %v204_v43, 1 }
 0x257   :  { %v209_v37 = vand.u32 255, %v208_v35  ;;  %vm213_vm5 = vcmp.ne.s32.totalorder %v211_v36, 0  ;;  %v206_v49 = vadd.f32 %v205_v46, %v204_v43 }
 0x258   :  { %v214_v41 = vsel %vm213_vm5, 1, %v303_v40 }
 0x259   :  { %v248_v39 = vadd.s32 4294967169, %v209_v37 }
 0x25b   :  { %v215_v42 = vadd.s32 %v248_v39, %v214_v41 }
 0x25d   :  { %v216_v44 = vsel %vm212_vm6, %v215_v42, 0 }
 0x25e   :  { %vm217_vm7 = vcmp.gt.s32.totalorder %v216_v44, 0 }
 0x25f   :  { %v218_v45 = vsel %vm217_vm7, %v216_v44, 0 }
 0x260   :  { %vm219_vm8 = vcmp.lt.s32.totalorder %v218_v45, 126 }
 0x261   :  { %v220_v47 = vsel %vm219_vm8, %v218_v45, 126 }
 0x262   :  { %v221_v48 = vsub.s32 127, %v220_v47 }
 0x264   :  { %v222_v50 = vshll.u32 %v221_v48, 23 }
 0x266   :  { %v224_v51 = vmul.f32 %v222_v50, %v206_v49 }
 0x268   :  { %281 = vpush %v224_v51 }
 0x299   :  { %s282_s1 = spop %281 }
 0x29a   :  { %228 = sst [smem:[#allocation2]] %s282_s1 }
 0x29b   :  { %297 = shalt.err (!%p294_p2)
}
 0x29c   :  { %s304_s5 = smov [#allocation2]  }
 0x29d   :  { %236 = dma.smem_to_hbm %s304_s5, 16, %s361_s2, [#allocation3]  }
 0x29e   :  { %298 = dma.done.wait [#allocation3], 16  }
 0x29f   :  { %299 = vsyncadd [#allocation3], 4294967280 }
 0x2a0   :  { %240 = sfence }
 0x2a1   :  { %241 = vsyncpa [#allocation3], 1 }

</bundles_post_ra>
